<compile_context>
chip_gen: v5e
topology: v5e:2x2
jax: 0.10.0
libtpu: 0.0.40
codegen_flags: <defaults>
</compile_context>

<pallas_src>
import functools

import jax
import jax.numpy as jnp
from jax.experimental import pallas as pl
from jax.experimental.pallas import tpu as pltpu


def _word_sent_att_kernel(q2_ref, k_ref, mask_ref, w_ref, b_ref, o_ref):
    # q2_ref:   (Bb*Lq, H2)  bf16   (batch folded into rows)
    # k_ref:    (Bb, Lk, E2) bf16
    # mask_ref: (Bb, 1, Lk)  f32
    # w_ref:    (H2, E2)     bf16
    # b_ref:    (1, E2)      f32
    # o_ref:    (Bb, Lq, E2) f32
    bb, lq, _ = o_ref.shape

    # Linear (+bias) + ReLU; dropout is identity in eval mode.
    # Single folded MXU matmul over all Bb*Lq query rows, f32 accumulation.
    q_feat = jnp.dot(q2_ref[...], w_ref[...], preferred_element_type=jnp.float32)
    q_feat = jnp.maximum(q_feat + b_ref[...], 0.0)          # (Bb*Lq, E2) f32

    # Attention is inherently per-batch; static unroll over the batch block.
    for bi in range(bb):
        qf = q_feat[bi * lq:(bi + 1) * lq, :].astype(jnp.bfloat16)   # (Lq, E2)
        kb = k_ref[bi]                                               # (Lk, E2) bf16
        mb = mask_ref[bi]                                            # (1, Lk)  f32

        # scores = q_feat . key^T  -- contract last dims, no explicit transpose.
        s = jax.lax.dot_general(qf, kb, (((1,), (1,)), ((), ())),
                                preferred_element_type=jnp.float32)  # (Lq, Lk)

        # Masked softmax, matching the module: score*mask + (mask-1)*1e13.
        s = s * mb + (mb - 1.0) * 1e13
        s = s - jnp.max(s, axis=-1, keepdims=True)
        p = jnp.exp(s)
        attn = p * pl.reciprocal(jnp.sum(p, axis=-1, keepdims=True), approx=True)

        # Weighted sum over (raw) keys.
        o_ref[bi] = jnp.dot(attn.astype(jnp.bfloat16), kb,
                            preferred_element_type=jnp.float32).astype(o_ref.dtype)


def _pick_block_b(B, Lq):
    # Fold enough batch elements per grid step to amortize per-step pipeline
    # overhead (~0.35us) and feed >=128 rows to the folded Linear matmul.
    target = max(1, -(-128 // max(Lq, 1)))   # cdiv(128, Lq)
    bb = min(B, target)
    while B % bb:
        bb -= 1
    return bb


@functools.partial(jax.jit, static_argnames=("block_b",))
def word_sent_att(query, key, key_mask, w, b, *, block_b=None):
    B, Lq, H2 = query.shape
    _, Lk, E2 = key.shape
    bb = block_b if block_b is not None else _pick_block_b(B, Lq)
    assert B % bb == 0

    # Wrapper-side (free) layout plumbing + bf16 casts for the MXU operands.
    q2d = query.reshape(B * Lq, H2).astype(jnp.bfloat16)
    k_bf = key.astype(jnp.bfloat16)
    w_bf = w.astype(jnp.bfloat16)
    mask3 = key_mask.reshape(B, 1, Lk).astype(jnp.float32)
    b2 = b.reshape(1, E2).astype(jnp.float32)

    return pl.pallas_call(
        _word_sent_att_kernel,
        out_shape=jax.ShapeDtypeStruct((B, Lq, E2), jnp.float32),
        grid_spec=pltpu.PrefetchScalarGridSpec(
            num_scalar_prefetch=0,
            grid=(B // bb,),
            in_specs=[
                pl.BlockSpec((bb * Lq, H2), lambda i: (i, 0)),
                pl.BlockSpec((bb, Lk, E2), lambda i: (i, 0, 0)),
                pl.BlockSpec((bb, 1, Lk), lambda i: (i, 0, 0)),
                pl.BlockSpec((H2, E2), lambda i: (0, 0)),
                pl.BlockSpec((1, E2), lambda i: (0, 0)),
            ],
            out_specs=pl.BlockSpec((bb, Lq, E2), lambda i: (i, 0, 0)),
        ),
        compiler_params=pltpu.CompilerParams(
            dimension_semantics=("parallel",),
            vmem_limit_bytes=32 * 1024 * 1024,
        ),
    )(q2d, k_bf, mask3, w_bf, b2)


def reference(query, key, key_mask, w, b):
    # Pure-JAX mirror of WordSentAtt.forward (eval mode), using the same
    # bf16-input / f32-accumulate matmul precision as the kernel.
    qb = query.astype(jnp.bfloat16)
    kb = key.astype(jnp.bfloat16)
    wb = w.astype(jnp.bfloat16)
    q_feat = jnp.maximum(
        jnp.einsum("blh,he->ble", qb, wb, preferred_element_type=jnp.float32) + b, 0.0)
    k_masked = kb * key_mask[..., None].astype(jnp.bfloat16)
    scores = jnp.einsum("bqe,bke->bqk", q_feat.astype(jnp.bfloat16), k_masked,
                        preferred_element_type=jnp.float32)
    m = key_mask[:, None, :]
    s = scores * m + (m - 1.0) * 1e13
    attn = jax.nn.softmax(s, axis=-1)
    return jnp.einsum("bqk,bke->bqe", attn.astype(jnp.bfloat16), kb,
                      preferred_element_type=jnp.float32)


if __name__ == "__main__":
    # Small shapes consistent with the module: hidden_size=16 -> H2=32,
    # embedding_size=16 -> E2=32, batch=2, Lq=8 query tokens, Lk=16 key tokens.
    B, Lq, Lk = 2, 8, 16
    hidden_size, embedding_size = 16, 16
    H2, E2 = 2 * hidden_size, 2 * embedding_size

    key0 = jax.random.PRNGKey(0)
    k_q, k_k, k_m, k_w = jax.random.split(key0, 4)

    query = jax.random.normal(k_q, (B, Lq, H2), dtype=jnp.float32)
    key_t = jax.random.normal(k_k, (B, Lk, E2), dtype=jnp.float32)
    # Binary key (padding) mask; keep the first positions valid.
    key_mask = (jax.random.uniform(k_m, (B, Lk)) > 0.3).astype(jnp.float32)
    key_mask = key_mask.at[:, :2].set(1.0)

    # Deterministic kaiming_uniform-style init for Linear(H2 -> E2); bias = 0.
    bound = (6.0 / H2) ** 0.5
    w_linear = jax.random.uniform(k_w, (E2, H2), minval=-bound, maxval=bound,
                                  dtype=jnp.float32)  # PyTorch (out, in)
    w = w_linear.T  # (H2, E2) so q @ W is the Linear
    b = jnp.zeros((E2,), dtype=jnp.float32)

    out = word_sent_att(query, key_t, key_mask, w, b)
    jax.block_until_ready(out)

    ref = reference(query, key_t, key_mask, w, b)
    assert out.shape == (B, Lq, E2)
    assert jnp.allclose(out, ref, atol=5e-3, rtol=5e-3), \
        float(jnp.max(jnp.abs(out - ref)))

    print("KERNEL_OK")
</pallas_src>

<mosaic_0001>
module attributes {stable_mosaic.version = 11 : i64} {
  func.func @_word_sent_att_kernel(%arg0: i32, %arg1: memref<16x32xbf16, #tpu.memory_space<vmem>>, %arg2: memref<2x16x32xbf16, #tpu.memory_space<vmem>>, %arg3: memref<2x1x16xf32, #tpu.memory_space<vmem>>, %arg4: memref<32x32xbf16, #tpu.memory_space<vmem>>, %arg5: memref<1x32xf32, #tpu.memory_space<vmem>>, %arg6: memref<2x8x32xf32, #tpu.memory_space<vmem>>) attributes {dimension_semantics = [#tpu.dimension_semantics<parallel>], iteration_bounds = array<i64: 1>, scalar_prefetch = 0 : i64, scratch_operands = 0 : i64, tpu.core_type = #tpu.core_type<tc>, window_params = [{transform_indices = @transform_0, window_bounds = array<i64: 16, 32>}, {transform_indices = @transform_1, window_bounds = array<i64: 2, 16, 32>}, {transform_indices = @transform_2, window_bounds = array<i64: 2, 1, 16>}, {pipeline_mode = #tpu.pipeline_mode<synchronous>, transform_indices = @transform_3, window_bounds = array<i64: 32, 32>}, {pipeline_mode = #tpu.pipeline_mode<synchronous>, transform_indices = @transform_4, window_bounds = array<i64: 1, 32>}, {transform_indices = @transform_5, window_bounds = array<i64: 2, 8, 32>}]} {
    %c0 = arith.constant 0 : index
    %c0_0 = arith.constant 0 : index
    %0 = vector.load %arg1[%c0, %c0_0] : memref<16x32xbf16, #tpu.memory_space<vmem>>, vector<16x32xbf16>
    %c0_1 = arith.constant 0 : index
    %c0_2 = arith.constant 0 : index
    %1 = vector.load %arg4[%c0_1, %c0_2] : memref<32x32xbf16, #tpu.memory_space<vmem>>, vector<32x32xbf16>
    %cst = arith.constant dense<0.000000e+00> : vector<16x32xf32>
    %2 = tpu.matmul %0, %1, %cst {dimension_numbers = #tpu.dot_dimension_numbers<[1], [0], [0], [1], [0, 0, 1, 1], [], []>} : vector<16x32xbf16>, vector<32x32xbf16>, vector<16x32xf32> -> vector<16x32xf32>
    %c0_3 = arith.constant 0 : index
    %c0_4 = arith.constant 0 : index
    %3 = vector.load %arg5[%c0_3, %c0_4] : memref<1x32xf32, #tpu.memory_space<vmem>>, vector<1x32xf32>
    %4 = vector.broadcast %3 : vector<1x32xf32> to vector<16x32xf32>
    %5 = arith.addf %2, %4 : vector<16x32xf32>
    %cst_5 = arith.constant 0.000000e+00 : f32
    %6 = vector.broadcast %cst_5 : f32 to vector<16x32xf32>
    %7 = arith.maximumf %5, %6 : vector<16x32xf32>
    %8 = vector.extract_strided_slice %7 {offsets = [0, 0], sizes = [8, 32], strides = [1, 1]} : vector<16x32xf32> to vector<8x32xf32>
    %9 = arith.truncf %8 : vector<8x32xf32> to vector<8x32xbf16>
    %c0_6 = arith.constant 0 : index
    %c0_7 = arith.constant 0 : index
    %c0_8 = arith.constant 0 : index
    %10 = vector.load %arg2[%c0_6, %c0_7, %c0_8] : memref<2x16x32xbf16, #tpu.memory_space<vmem>>, vector<1x16x32xbf16>
    %11 = vector.shape_cast %10 : vector<1x16x32xbf16> to vector<16x32xbf16>
    %c0_9 = arith.constant 0 : index
    %c0_10 = arith.constant 0 : index
    %c0_11 = arith.constant 0 : index
    %12 = vector.load %arg3[%c0_9, %c0_10, %c0_11] : memref<2x1x16xf32, #tpu.memory_space<vmem>>, vector<1x1x16xf32>
    %13 = vector.shape_cast %12 : vector<1x1x16xf32> to vector<1x16xf32>
    %cst_12 = arith.constant dense<0.000000e+00> : vector<8x16xf32>
    %14 = tpu.matmul %9, %11, %cst_12 {dimension_numbers = #tpu.dot_dimension_numbers<[1], [1], [0], [0], [0, 0, 1, 0], [], []>} : vector<8x32xbf16>, vector<16x32xbf16>, vector<8x16xf32> -> vector<8x16xf32>
    %15 = vector.broadcast %13 : vector<1x16xf32> to vector<8x16xf32>
    %16 = arith.mulf %14, %15 : vector<8x16xf32>
    %cst_13 = arith.constant 1.000000e+00 : f32
    %17 = vector.broadcast %cst_13 : f32 to vector<1x16xf32>
    %18 = arith.subf %13, %17 : vector<1x16xf32>
    %cst_14 = arith.constant 9.99999982E+12 : f32
    %19 = vector.broadcast %cst_14 : f32 to vector<1x16xf32>
    %20 = arith.mulf %18, %19 : vector<1x16xf32>
    %21 = vector.broadcast %20 : vector<1x16xf32> to vector<8x16xf32>
    %22 = arith.addf %16, %21 : vector<8x16xf32>
    %cst_15 = arith.constant dense<0xFF800000> : vector<8xf32>
    %23 = vector.multi_reduction <maximumf>, %22, %cst_15 [1] : vector<8x16xf32> to vector<8xf32>
    %24 = vector.shape_cast %23 : vector<8xf32> to vector<8x1xf32>
    %25 = vector.broadcast %24 : vector<8x1xf32> to vector<8x16xf32>
    %26 = arith.subf %22, %25 : vector<8x16xf32>
    %27 = math.exp %26 : vector<8x16xf32>
    %cst_16 = arith.constant dense<0.000000e+00> : vector<8xf32>
    %28 = vector.multi_reduction <add>, %27, %cst_16 [1] : vector<8x16xf32> to vector<8xf32>
    %29 = vector.shape_cast %28 : vector<8xf32> to vector<8x1xf32>
    %30 = tpu.reciprocal %29 {approx = true} : vector<8x1xf32> -> vector<8x1xf32>
    %31 = vector.broadcast %30 : vector<8x1xf32> to vector<8x16xf32>
    %32 = arith.mulf %27, %31 : vector<8x16xf32>
    %33 = arith.truncf %32 : vector<8x16xf32> to vector<8x16xbf16>
    %cst_17 = arith.constant dense<0.000000e+00> : vector<8x32xf32>
    %34 = tpu.matmul %33, %11, %cst_17 {dimension_numbers = #tpu.dot_dimension_numbers<[1], [0], [0], [1], [0, 0, 1, 1], [], []>} : vector<8x16xbf16>, vector<16x32xbf16>, vector<8x32xf32> -> vector<8x32xf32>
    %c0_18 = arith.constant 0 : index
    %c0_19 = arith.constant 0 : index
    %c0_20 = arith.constant 0 : index
    %35 = vector.load %arg6[%c0_18, %c0_19, %c0_20] : memref<2x8x32xf32, #tpu.memory_space<vmem>>, vector<1x8x32xf32>
    %36 = vector.shape_cast %35 : vector<1x8x32xf32> to vector<8x32xf32>
    %37 = vector.shape_cast %34 : vector<8x32xf32> to vector<1x8x32xf32>
    tpu.vector_store %arg6[%c0_18, %c0_19, %c0_20], %37 {strides = array<i32>} : memref<2x8x32xf32, #tpu.memory_space<vmem>>, vector<1x8x32xf32>,
    %38 = vector.extract_strided_slice %7 {offsets = [8, 0], sizes = [8, 32], strides = [1, 1]} : vector<16x32xf32> to vector<8x32xf32>
    %39 = arith.truncf %38 : vector<8x32xf32> to vector<8x32xbf16>
    %c1 = arith.constant 1 : index
    %c0_21 = arith.constant 0 : index
    %c0_22 = arith.constant 0 : index
    %40 = vector.load %arg2[%c1, %c0_21, %c0_22] : memref<2x16x32xbf16, #tpu.memory_space<vmem>>, vector<1x16x32xbf16>
    %41 = vector.shape_cast %40 : vector<1x16x32xbf16> to vector<16x32xbf16>
    %c1_23 = arith.constant 1 : index
    %c0_24 = arith.constant 0 : index
    %c0_25 = arith.constant 0 : index
    %42 = vector.load %arg3[%c1_23, %c0_24, %c0_25] : memref<2x1x16xf32, #tpu.memory_space<vmem>>, vector<1x1x16xf32>
    %43 = vector.shape_cast %42 : vector<1x1x16xf32> to vector<1x16xf32>
    %cst_26 = arith.constant dense<0.000000e+00> : vector<8x16xf32>
    %44 = tpu.matmul %39, %41, %cst_26 {dimension_numbers = #tpu.dot_dimension_numbers<[1], [1], [0], [0], [0, 0, 1, 0], [], []>} : vector<8x32xbf16>, vector<16x32xbf16>, vector<8x16xf32> -> vector<8x16xf32>
    %45 = vector.broadcast %43 : vector<1x16xf32> to vector<8x16xf32>
    %46 = arith.mulf %44, %45 : vector<8x16xf32>
    %cst_27 = arith.constant 1.000000e+00 : f32
    %47 = vector.broadcast %cst_27 : f32 to vector<1x16xf32>
    %48 = arith.subf %43, %47 : vector<1x16xf32>
    %cst_28 = arith.constant 9.99999982E+12 : f32
    %49 = vector.broadcast %cst_28 : f32 to vector<1x16xf32>
    %50 = arith.mulf %48, %49 : vector<1x16xf32>
    %51 = vector.broadcast %50 : vector<1x16xf32> to vector<8x16xf32>
    %52 = arith.addf %46, %51 : vector<8x16xf32>
    %cst_29 = arith.constant dense<0xFF800000> : vector<8xf32>
    %53 = vector.multi_reduction <maximumf>, %52, %cst_29 [1] : vector<8x16xf32> to vector<8xf32>
    %54 = vector.shape_cast %53 : vector<8xf32> to vector<8x1xf32>
    %55 = vector.broadcast %54 : vector<8x1xf32> to vector<8x16xf32>
    %56 = arith.subf %52, %55 : vector<8x16xf32>
    %57 = math.exp %56 : vector<8x16xf32>
    %cst_30 = arith.constant dense<0.000000e+00> : vector<8xf32>
    %58 = vector.multi_reduction <add>, %57, %cst_30 [1] : vector<8x16xf32> to vector<8xf32>
    %59 = vector.shape_cast %58 : vector<8xf32> to vector<8x1xf32>
    %60 = tpu.reciprocal %59 {approx = true} : vector<8x1xf32> -> vector<8x1xf32>
    %61 = vector.broadcast %60 : vector<8x1xf32> to vector<8x16xf32>
    %62 = arith.mulf %57, %61 : vector<8x16xf32>
    %63 = arith.truncf %62 : vector<8x16xf32> to vector<8x16xbf16>
    %cst_31 = arith.constant dense<0.000000e+00> : vector<8x32xf32>
    %64 = tpu.matmul %63, %41, %cst_31 {dimension_numbers = #tpu.dot_dimension_numbers<[1], [0], [0], [1], [0, 0, 1, 1], [], []>} : vector<8x16xbf16>, vector<16x32xbf16>, vector<8x32xf32> -> vector<8x32xf32>
    %c1_32 = arith.constant 1 : index
    %c0_33 = arith.constant 0 : index
    %c0_34 = arith.constant 0 : index
    %65 = vector.load %arg6[%c1_32, %c0_33, %c0_34] : memref<2x8x32xf32, #tpu.memory_space<vmem>>, vector<1x8x32xf32>
    %66 = vector.shape_cast %65 : vector<1x8x32xf32> to vector<8x32xf32>
    %67 = vector.shape_cast %64 : vector<8x32xf32> to vector<1x8x32xf32>
    tpu.vector_store %arg6[%c1_32, %c0_33, %c0_34], %67 {strides = array<i32>} : memref<2x8x32xf32, #tpu.memory_space<vmem>>, vector<1x8x32xf32>,
    return
  }
  func.func @transform_0(%arg0: i32) -> (i32, i32) {
    %c0_i32 = arith.constant 0 : i32
    %c0_i32_0 = arith.constant 0 : i32
    return %arg0, %c0_i32 : i32, i32
  }
  func.func @transform_1(%arg0: i32) -> (i32, i32, i32) {
    %c0_i32 = arith.constant 0 : i32
    %c0_i32_0 = arith.constant 0 : i32
    %c0_i32_1 = arith.constant 0 : i32
    return %arg0, %c0_i32, %c0_i32_0 : i32, i32, i32
  }
  func.func @transform_2(%arg0: i32) -> (i32, i32, i32) {
    %c0_i32 = arith.constant 0 : i32
    %c0_i32_0 = arith.constant 0 : i32
    %c0_i32_1 = arith.constant 0 : i32
    return %arg0, %c0_i32, %c0_i32_0 : i32, i32, i32
  }
  func.func @transform_3(%arg0: i32) -> (i32, i32) {
    %c0_i32 = arith.constant 0 : i32
    %c0_i32_0 = arith.constant 0 : i32
    %c0_i32_1 = arith.constant 0 : i32
    return %c0_i32, %c0_i32_0 : i32, i32
  }
  func.func @transform_4(%arg0: i32) -> (i32, i32) {
    %c0_i32 = arith.constant 0 : i32
    %c0_i32_0 = arith.constant 0 : i32
    %c0_i32_1 = arith.constant 0 : i32
    return %c0_i32, %c0_i32_0 : i32, i32
  }
  func.func @transform_5(%arg0: i32) -> (i32, i32, i32) {
    %c0_i32 = arith.constant 0 : i32
    %c0_i32_0 = arith.constant 0 : i32
    %c0_i32_1 = arith.constant 0 : i32
    return %arg0, %c0_i32, %c0_i32_0 : i32, i32, i32
  }
}

</mosaic_0001>

<bundles_post_ra>
// kernel: word_sent_att.1
= control target key start
LH: loop header
LB: loop body
LE: loop exit
PB: predicated region body
PF: predicated region fallthrough
CT: control target
= control target key end

     0   :  { %s381_s0 = inlined_call_operand.vmem [shape: bf16[16,32], index: 0, kind: input, shape index: {}]   ;;  %s382_s1 = inlined_call_operand.vmem [shape: bf16[2,16,32], index: 1, kind: input, shape index: {}]   ;;  %s383_s2 = inlined_call_operand.vmem [shape: f32[2,1,16], index: 2, kind: input, shape index: {}]   ;;  %s384_s3 = inlined_call_operand.vmem [shape: bf16[32,32], index: 3, kind: input, shape index: {}]   ;;  %s385_s4 = inlined_call_operand.vmem [shape: f32[1,32], index: 4, kind: input, shape index: {}]   ;;  %s386_s5 = inlined_call_operand.hbm [shape: f32[2,8,32], index: 5, kind: output, shape index: {}]  }
   0x1   :  { %v259_v0 = vld [vmem:[%s384_s3 + $0x8] sm:$0xff] }
   0x2   :  { %10 = vsyncpa [#allocation3], 0  ;;  %59 = vmatpush.bf16.msra.mxu0 %v259_v0  ;;  %v258_v1 = vld [vmem:[%s384_s3] sm:$0xff]  ;;  %vm49_vm0 = vcmask 261120   ;;  %v261_v5 = vld [vmem:[%s382_s1 + $0x8] sm:$0xff]  ;;  %vm107_vm1 = vcmask 130048  }
   0x3   :  { %v257_v2 = vld [vmem:[%s381_s0] sm:$0xff]  ;;  %v153_v6 = vsel %vm49_vm0, %v261_v5, 0  ;;  %s215_s12 = sshll.u32 %s386_s5, 4  ;;  %s303_s13 = smov 128   ;;  %s216_s12 = int_to_ptr.hbm [resolvable:$true] %s215_s12 }
   0x4   :  { %v260_v3 = vld [vmem:[%s382_s1] sm:$0xff]  ;;  %162 = vmatpush.bf16.xpose.msra.mxu3 %v153_v6  ;;  %s304_s14 = smov 8  }
   0x5   :  { %v82_v4 = vsel %vm49_vm0, %v260_v3, 0  ;;  %131 = vmatpush.bf16.msra.mxu2 %v260_v3  ;;  %v265_v7 = vld [vmem:[%s385_s4] ss:$0 sm:$0xff]  ;;  %v249_v23 = vld [vmem:[%s383_s2 + $0x1] sm:$0x1] }
   0x6   :  { %60 = vmatpush.bf16.msra.mxu0 %v258_v1  ;;  %91 = vmatpush.bf16.xpose.msra.mxu1 %v82_v4  ;;  %v72_v16 = vld [vmem:[%s383_s2] sm:$0x1]  ;;  %v255_v26 = vadd.f32 -1.0, %v249_v23  ;;  %v267_v29 = vld [vmem:[%s383_s2 + $0x1] ss:$0 sm:$0xff] }
   0x7   :  { %v245_v17 = vadd.f32 -1.0, %v72_v16  ;;  %v266_v19 = vld [vmem:[%s383_s2] ss:$0 sm:$0xff]  ;;  %s302_s2 = smov [#allocation2]  }
   0x8   :  { %v173_v28 = vmul.f32 1e+13, %v255_v26  ;;  %s213_s9 = sshll.u32 %s302_s2, 4  ;;  %s214_s9 = int_to_ptr.vmem [resolvable:$true] %s213_s9 }
   0x9   :  { %239 = vmatmul.msk.bf16.vlgmr.msra.gmra.mxu0 %vm49_vm0, %v257_v2  ;;  %201 = vmatpush.bf16.msrb.mxu2 %v261_v5  ;;  %v102_v18 = vmul.f32 1e+13, %v245_v17 }
   0xa   :  { %v175_v30 = vperm.slane %v173_v28, 0 }
   0xb   :  { %v104_v20 = vperm.slane %v102_v18, 0 }
  0x86   :  { %v62_v8 = vpop.f32.mrf.mxu0 }
  0x87   :  { %v63_v9 = vadd.f32 %v265_v7, %v62_v8 }
  0x89   :  { %v67_v10 = vmax.f32 %v63_v9, 0.0 }
  0x8b   :  { %v69_v11 = vpack.c.bf16 %v67_v10, %v67_v10 }
  0x8d   :  { %244 = vmatmul.msk.bf16.vlgmr.msra.gmra.mxu1 %vm49_vm0, %v69_v11 }
  0x8e   :  { %v64_v12 = vpop.f32.mrf.mxu0 }
  0x8f   :  { %v65_v13 = vadd.f32 %v265_v7, %v64_v12 }
  0x91   :  { %v68_v14 = vmax.f32 %v65_v13, 0.0 }
  0x93   :  { %v138_v15 = vpack.c.bf16 %v68_v14, %v68_v14 }
  0x95   :  { %254 = vmatmul.msk.bf16.vlgmr.msra.gmra.mxu3 %vm49_vm0, %v138_v15 }
 0x10a   :  { %v93_v21 = vpop.f32.mrf.mxu1 }
 0x10b   :  { %v100_v22 = vmul.f32 %v266_v19, %v93_v21 }
 0x10d   :  { %v106_v24 = vadd.f32 %v104_v20, %v100_v22 }
 0x10f   :  { %v108_v25 = vsel %vm107_vm1, %v106_v24, -inf }
 0x110   :  { %109 = vmax.xlane.f32.xlu0 %v108_v25 }
 0x112   :  { %v95_v27 = vpop.f32.mrf.mxu1 }
 0x118   :  { %v164_v31 = vpop.f32.mrf.mxu3 }
 0x119   :  { %v171_v32 = vmul.f32 %v267_v29, %v164_v31 }
 0x11b   :  { %v177_v33 = vadd.f32 %v175_v30, %v171_v32 }
 0x11d   :  { %v178_v34 = vsel %vm107_vm1, %v177_v33, -inf }
 0x11e   :  { %179 = vmax.xlane.f32.xlu0 %v178_v34 }
 0x120   :  { %v166_v35 = vpop.f32.mrf.mxu3 }
 0x183   :  { %v110_v36 = vpop.xlane.xlu0 %109 }
 0x184   :  { %v111_v37 = vsub.f32 %v106_v24, %v110_v36 }
 0x186   :  { %v112_v38 = vmul.f32 1.442695, %v111_v37 }
 0x188   :  { %268 = vpow2.f32 %v112_v38 }
 0x18e   :  { %v269_v39 = vpop.eup %268 }
 0x18f   :  { %v114_v40 = vsel %vm107_vm1, %v269_v39, 0.0 }
 0x190   :  { %115 = vadd.xlane.f32.xlu1 %v114_v40 }
 0x191   :  { %v180_v41 = vpop.xlane.xlu0 %179 }
 0x192   :  { %v181_v42 = vsub.f32 %v177_v33, %v180_v41 }
 0x194   :  { %v182_v43 = vmul.f32 1.442695, %v181_v42 }
 0x196   :  { %270 = vpow2.f32 %v182_v43 }
 0x19c   :  { %v271_v44 = vpop.eup %270 }
 0x19d   :  { %v184_v45 = vsel %vm107_vm1, %v271_v44, 0.0 }
 0x19e   :  { %185 = vadd.xlane.f32.xlu1 %v184_v45 }
 0x203   :  { %v116_v46 = vpop.xlane.xlu1 %115 }
 0x204   :  { %272 = vrcp.f32 %v116_v46 }
 0x20a   :  { %v273_v47 = vpop.eup %272 }
 0x20b   :  { %v118_v48 = vmul.f32 %v273_v47, %v269_v39 }
 0x20d   :  { %v119_v49 = vpack.c.bf16 %v118_v48, %v118_v48 }
 0x20f   :  { %246 = vmatmul.msk.bf16.vlgmr.msra.gmra.mxu2 %vm107_vm1, %v119_v49 }
 0x211   :  { %v186_v50 = vpop.xlane.xlu1 %185 }
 0x212   :  { %274 = vrcp.f32 %v186_v50 }
 0x218   :  { %v275_v51 = vpop.eup %274 }
 0x219   :  { %v188_v52 = vmul.f32 %v275_v51, %v271_v44 }
 0x21b   :  { %v189_v53 = vpack.c.bf16 %v188_v52, %v188_v52 }
 0x21f   :  { %256 = vmatmul.msk.bf16.vlgmr.msrb.gmra.mxu2 %vm107_vm1, %v189_v53 }
 0x292   :  { %v133_v54 = vpop.f32.mrf.mxu2 }
 0x293   :  { %137 = vst.msk [vmem:[#allocation2] sm:$0xff] %vm49_vm0, %v133_v54 }
 0x29a   :  { %v135_v55 = vpop.f32.mrf.mxu2 }
 0x2a2   :  { %v203_v56 = vpop.f32.mrf.mxu2 }
 0x2a3   :  { %208 = vst.msk [vmem:[#allocation2 + $0x8] sm:$0xff] %vm49_vm0, %v203_v56 }
 0x2a4   :  { %221 = dma.vmem_to_hbm [thread:$0]  %s214_s9, 256, %s216_s12, [#allocation3], %s303_s13, %s303_s13, %s304_s14  }
 0x2aa   :  { %v205_v57 = vpop.f32.mrf.mxu2 }
 0x2ab   :  { %300 = dma.done.wait [#allocation3], 256  }
 0x2ac   :  { %301 = vsyncadd [#allocation3], 4294967040 }
 0x2ad   :  { %226 = vsyncpa [#allocation3], 1 }

</bundles_post_ra>
